<compile_context>
chip_gen: v7x
topology: tpu7x:2x2x1
jax: 0.10.0
libtpu: 0.0.40
codegen_flags: <defaults>
</compile_context>

<pallas_src>
import functools

import jax
import jax.numpy as jnp
from jax.experimental import pallas as pl
from jax.experimental.pallas import tpu as pltpu


def _fp_kernel(x_src_ref, pos_src_t_ref, src_sq_ref, batch_src_ref,
               pos_tgt_ref, batch_tgt_ref, x_skip_ref,
               w_int_ref, w_skip_ref, b_ref, scale_ref, shift_ref,
               out_ref, *, k, idx_bits):
    pt = pos_tgt_ref[...]              # [TT, 8]  target positions (xyz + zero pad)
    bt = batch_tgt_ref[...]            # [TT, 1]  int32
    bs = batch_src_ref[...]            # [1, Ns]  int32 (-1 in padded columns)

    # Pairwise squared distances, expanded form -> a single MXU dot.
    # Source squared norms are grid-invariant and hoisted to the wrapper.
    d2 = (jnp.sum(pt * pt, axis=-1, keepdims=True)
          + src_sq_ref[...]
          - 2.0 * jnp.dot(pt, pos_src_t_ref[...],
                          preferred_element_type=jnp.float32))      # [TT, Ns]
    # Clamp kept on purpose (one VPU pass per *tile*): the packed-key trick
    # below bitcasts d2 to int32 and needs d2 >= 0 for an order-preserving key.
    d2 = jnp.maximum(d2, 0.0)

    ns = d2.shape[-1]
    idx_mask = (1 << idx_bits) - 1
    col = jax.lax.broadcasted_iota(jnp.int32, (1, ns), 1)            # row iota only

    # Pack (truncated distance, column index) into one sortable int32 key so a
    # single cross-lane min per k-iteration yields both the min distance and
    # its first-index argmin (exact argsort tie-break parity up to the
    # truncated low mantissa bits, rel. error ~2^-(23-idx_bits)).
    key = (pltpu.bitcast(d2, jnp.int32) & ~idx_mask) | col
    big = jnp.int32(2**31 - 1)
    cur = jnp.where(bt == bs, key, big)        # mask cross-batch & padded columns

    wsel = jnp.zeros(cur.shape, dtype=jnp.float32)     # sparse 1/d^2 weights
    den = jnp.zeros((cur.shape[0], 1), dtype=jnp.float32)

    # Iteratively select the k nearest same-batch sources (k small & static):
    # one XLU reduction + a few VPU passes over [TT, Ns] per neighbour.
    for _ in range(k):
        mk = jnp.min(cur, axis=-1, keepdims=True)                    # [TT, 1]
        amin = mk & idx_mask                                         # argmin column
        m = pltpu.bitcast(mk & ~idx_mask, jnp.float32)               # its d^2
        m_ok = mk < big                  # row still has an unused same-batch source
        # 1 / d^2 of the selected neighbour (EUP reciprocal, off the VALU).
        w_m = jnp.where(m_ok,
                        pl.reciprocal(jnp.maximum(m, 1e-16), approx=True),
                        0.0)                                         # [TT, 1]
        onehot = col == amin                                         # [TT, Ns]
        wsel = wsel + jnp.where(onehot, w_m, 0.0)
        den = den + w_m
        cur = jnp.where(onehot, big, cur)

    # knn_interpolate: normalized inverse-distance weighted sum of source feats.
    num = jnp.dot(wsel, x_src_ref[...], preferred_element_type=jnp.float32)
    inv_den = jnp.where(den > 0.0, pl.reciprocal(den, approx=True), 0.0)
    interp = num * inv_den                                           # [TT, Cin_p]

    # cat([interp, x_skip], 1) @ W + b == interp @ W[:Cin] + x_skip @ W[Cin:] + b
    # (W pre-split & padded in the wrapper: no in-kernel slicing / relayout).
    h = (jnp.dot(interp, w_int_ref[...], preferred_element_type=jnp.float32)
         + jnp.dot(x_skip_ref[...], w_skip_ref[...],
                   preferred_element_type=jnp.float32)
         + b_ref[...])
    h = jnp.maximum(h, 0.0)                                          # ReLU
    # BatchNorm1d in eval mode, folded to affine scale/shift.
    # TODO(synk): train-mode BatchNorm1d (batch statistics) not implemented.
    out_ref[...] = h * scale_ref[...] + shift_ref[...]


def fp_module_forward(x, pos, batch, x_skip, pos_skip, batch_skip,
                      W, b, bn_gamma, bn_beta, bn_mean, bn_var,
                      *, k=3, bn_eps=1e-5, tile_t=None):
    n_src, c_in = x.shape
    n_tgt, c_skip = x_skip.shape
    hidden = W.shape[1]

    # ---- generation-aware sizing ---------------------------------------------
    try:
        vmem_cap = int(pltpu.get_tpu_info().vmem_capacity_bytes)
    except Exception:
        vmem_cap = 64 * 1024 * 1024       # conservative (v7x per-core) fallback
    vmem_limit = int(0.75 * vmem_cap)

    n_src_p = 128 * pl.cdiv(n_src, 128)   # lane-dense source axis

    if tile_t is None:
        tile_t = 128
        # Keep the handful of live [tile_t, Ns_p] f32 buffers well inside VMEM.
        while tile_t > 32 and 4 * tile_t * n_src_p * 4 > vmem_limit // 3:
            tile_t //= 2
        # Give dual-TC chips (v7x) >= 2 parallel grid steps when possible.
        while tile_t > 8 and pl.cdiv(n_tgt, tile_t) < 2:
            tile_t //= 2

    # ---- layout plumbing (no hot-path compute) --------------------------------
    n_tgt_p = tile_t * pl.cdiv(n_tgt, tile_t)
    hidden_p = 128 * pl.cdiv(hidden, 128)
    c_in_p = 8 * pl.cdiv(c_in, 8)
    c_skip_p = 8 * pl.cdiv(c_skip, 8)
    pad_t, pad_s, pad_h = n_tgt_p - n_tgt, n_src_p - n_src, hidden_p - hidden
    idx_bits = (n_src_p - 1).bit_length()      # >= 7 (n_src_p is a mult of 128)

    # Sources: zero-pad features/positions, -1 sentinel in padded batch columns.
    x_src = jnp.pad(x.astype(jnp.float32), ((0, pad_s), (0, c_in_p - c_in)))
    pos_src_t = jnp.pad(jnp.transpose(pos).astype(jnp.float32),
                        ((0, 8 - 3), (0, pad_s)))                  # [8, Ns_p]
    src_sq = jnp.sum(pos_src_t * pos_src_t, axis=0, keepdims=True)  # [1, Ns_p]
    batch_src = jnp.pad(batch.astype(jnp.int32), (0, pad_s),
                        constant_values=-1).reshape(1, n_src_p)

    # Targets: pad rows with a -2 batch id so padded rows match nothing.
    pos_tgt = jnp.pad(pos_skip.astype(jnp.float32), ((0, pad_t), (0, 8 - 3)))
    batch_tgt = jnp.pad(batch_skip.astype(jnp.int32), (0, pad_t),
                        constant_values=-2).reshape(n_tgt_p, 1)
    x_skip_p = jnp.pad(x_skip.astype(jnp.float32),
                       ((0, pad_t), (0, c_skip_p - c_skip)))

    # Linear weight split into interp / skip row blocks, sublane + lane padded.
    Wf = W.astype(jnp.float32)
    W_int = jnp.pad(Wf[:c_in, :], ((0, c_in_p - c_in), (0, pad_h)))
    W_skip = jnp.pad(Wf[c_in:, :], ((0, c_skip_p - c_skip), (0, pad_h)))
    b_p = jnp.pad(b.astype(jnp.float32), (0, pad_h)).reshape(1, hidden_p)
    scale = (bn_gamma / jnp.sqrt(bn_var + bn_eps)).astype(jnp.float32)
    shift = (bn_beta - bn_mean * scale).astype(jnp.float32)
    scale_p = jnp.pad(scale, (0, pad_h)).reshape(1, hidden_p)
    shift_p = jnp.pad(shift, (0, pad_h)).reshape(1, hidden_p)

    full = lambda i: (0, 0)
    out_p = pl.pallas_call(
        functools.partial(_fp_kernel, k=k, idx_bits=idx_bits),
        out_shape=jax.ShapeDtypeStruct((n_tgt_p, hidden_p), jnp.float32),
        grid=(n_tgt_p // tile_t,),
        in_specs=[
            pl.BlockSpec((n_src_p, c_in_p), full),               # x (source feats)
            pl.BlockSpec((8, n_src_p), full),                    # pos^T (source)
            pl.BlockSpec((1, n_src_p), full),                    # |pos_src|^2
            pl.BlockSpec((1, n_src_p), full),                    # batch (source)
            pl.BlockSpec((tile_t, 8), lambda i: (i, 0)),         # pos_skip tile
            pl.BlockSpec((tile_t, 1), lambda i: (i, 0)),         # batch_skip tile
            pl.BlockSpec((tile_t, c_skip_p), lambda i: (i, 0)),  # x_skip tile
            pl.BlockSpec((c_in_p, hidden_p), full),              # W (interp rows)
            pl.BlockSpec((c_skip_p, hidden_p), full),            # W (skip rows)
            pl.BlockSpec((1, hidden_p), full),                   # Linear bias
            pl.BlockSpec((1, hidden_p), full),                   # BN scale
            pl.BlockSpec((1, hidden_p), full),                   # BN shift
        ],
        out_specs=pl.BlockSpec((tile_t, hidden_p), lambda i: (i, 0)),
        compiler_params=pltpu.CompilerParams(
            dimension_semantics=("parallel",),
            vmem_limit_bytes=vmem_limit),
    )(x_src, pos_src_t, src_sq, batch_src,
      pos_tgt, batch_tgt, x_skip_p,
      W_int, W_skip, b_p, scale_p, shift_p)

    return out_p[:n_tgt, :hidden], pos_skip, batch_skip


def _ref_forward(x, pos, batch, x_skip, pos_skip, batch_skip,
                 W, b, gamma, beta, mean, var, *, k, eps=1e-5):
    # Pure-JAX reference mirroring torch_geometric.knn_interpolate + Lin/ReLU/BN.
    d2 = jnp.sum((pos_skip[:, None, :] - pos[None, :, :]) ** 2, -1)
    same = batch_skip[:, None] == batch[None, :]
    d2m = jnp.where(same, d2, jnp.inf)
    idx = jnp.argsort(d2m, axis=-1)[:, :k]
    dsel = jnp.take_along_axis(d2, idx, axis=-1)
    wgt = 1.0 / jnp.maximum(dsel, 1e-16)
    interp = jnp.sum(wgt[..., None] * x[idx], axis=1) / jnp.sum(wgt, 1, keepdims=True)
    feat = jnp.concatenate([interp, x_skip], axis=1)
    h = jnp.maximum(feat @ W + b, 0.0)
    scale = gamma / jnp.sqrt(var + eps)
    return h * scale + (beta - mean * scale)


if __name__ == "__main__":
    # Small synthetic point-cloud problem:
    #   2 batches, 16 source points/batch (coarse), 32 target points/batch (fine).
    K = 3
    N_SRC, N_TGT = 32, 64
    C_IN, C_SKIP, HIDDEN = 8, 8, 32

    key = jax.random.PRNGKey(0)
    ks = jax.random.split(key, 10)
    x = jax.random.normal(ks[0], (N_SRC, C_IN), jnp.float32)
    pos = jax.random.normal(ks[1], (N_SRC, 3), jnp.float32)
    x_skip = jax.random.normal(ks[2], (N_TGT, C_SKIP), jnp.float32)
    pos_skip = jax.random.normal(ks[3], (N_TGT, 3), jnp.float32)
    batch = jnp.repeat(jnp.arange(2, dtype=jnp.int32), N_SRC // 2)
    batch_skip = jnp.repeat(jnp.arange(2, dtype=jnp.int32), N_TGT // 2)

    # Deterministic parameters for self.nn = Seq(Lin(16, 32), ReLU(), BN(32)).
    W = 0.1 * jax.random.normal(ks[4], (C_IN + C_SKIP, HIDDEN), jnp.float32)
    b = 0.1 * jax.random.normal(ks[5], (HIDDEN,), jnp.float32)
    bn_gamma = 1.0 + 0.1 * jax.random.normal(ks[6], (HIDDEN,), jnp.float32)
    bn_beta = 0.1 * jax.random.normal(ks[7], (HIDDEN,), jnp.float32)
    bn_mean = 0.1 * jax.random.normal(ks[8], (HIDDEN,), jnp.float32)
    bn_var = 0.5 + jnp.abs(jax.random.normal(ks[9], (HIDDEN,), jnp.float32))

    out, pos_out, batch_out = fp_module_forward(
        x, pos, batch, x_skip, pos_skip, batch_skip,
        W, b, bn_gamma, bn_beta, bn_mean, bn_var, k=K)
    jax.block_until_ready(out)

    ref = _ref_forward(x, pos, batch, x_skip, pos_skip, batch_skip,
                       W, b, bn_gamma, bn_beta, bn_mean, bn_var, k=K)
    assert out.shape == (N_TGT, HIDDEN)
    assert pos_out.shape == (N_TGT, 3) and batch_out.shape == (N_TGT,)
    # Tolerance covers EUP approximate reciprocals (~2^-12 rel) and the
    # packed-key distance truncation (~2^-(23-idx_bits) rel).
    assert jnp.allclose(out, ref, rtol=2e-3, atol=2e-3), "kernel mismatch vs reference"
    print("KERNEL_OK")
</pallas_src>

<mosaic_0001>
module attributes {stable_mosaic.version = 11 : i64} {
  func.func @_fp_kernel(%arg0: i32, %arg1: memref<128x8xf32, #tpu.memory_space<vmem>>, %arg2: memref<8x128xf32, #tpu.memory_space<vmem>>, %arg3: memref<1x128xf32, #tpu.memory_space<vmem>>, %arg4: memref<1x128xi32, #tpu.memory_space<vmem>>, %arg5: memref<32x8xf32, #tpu.memory_space<vmem>>, %arg6: memref<32x1xi32, #tpu.memory_space<vmem>>, %arg7: memref<32x8xf32, #tpu.memory_space<vmem>>, %arg8: memref<8x128xf32, #tpu.memory_space<vmem>>, %arg9: memref<8x128xf32, #tpu.memory_space<vmem>>, %arg10: memref<1x128xf32, #tpu.memory_space<vmem>>, %arg11: memref<1x128xf32, #tpu.memory_space<vmem>>, %arg12: memref<1x128xf32, #tpu.memory_space<vmem>>, %arg13: memref<32x128xf32, #tpu.memory_space<vmem>>) attributes {dimension_semantics = [#tpu.dimension_semantics<parallel>], iteration_bounds = array<i64: 2>, scalar_prefetch = 0 : i64, scratch_operands = 0 : i64, tpu.core_type = #tpu.core_type<tc>, window_params = [{pipeline_mode = #tpu.pipeline_mode<synchronous>, transform_indices = @transform_0, window_bounds = array<i64: 128, 8>}, {pipeline_mode = #tpu.pipeline_mode<synchronous>, transform_indices = @transform_1, window_bounds = array<i64: 8, 128>}, {pipeline_mode = #tpu.pipeline_mode<synchronous>, transform_indices = @transform_2, window_bounds = array<i64: 1, 128>}, {pipeline_mode = #tpu.pipeline_mode<synchronous>, transform_indices = @transform_3, window_bounds = array<i64: 1, 128>}, {transform_indices = @transform_4, window_bounds = array<i64: 32, 8>}, {transform_indices = @transform_5, window_bounds = array<i64: 32, 1>}, {transform_indices = @transform_6, window_bounds = array<i64: 32, 8>}, {pipeline_mode = #tpu.pipeline_mode<synchronous>, transform_indices = @transform_7, window_bounds = array<i64: 8, 128>}, {pipeline_mode = #tpu.pipeline_mode<synchronous>, transform_indices = @transform_8, window_bounds = array<i64: 8, 128>}, {pipeline_mode = #tpu.pipeline_mode<synchronous>, transform_indices = @transform_9, window_bounds = array<i64: 1, 128>}, {pipeline_mode = #tpu.pipeline_mode<synchronous>, transform_indices = @transform_10, window_bounds = array<i64: 1, 128>}, {pipeline_mode = #tpu.pipeline_mode<synchronous>, transform_indices = @transform_11, window_bounds = array<i64: 1, 128>}, {transform_indices = @transform_12, window_bounds = array<i64: 32, 128>}]} {
    %c0 = arith.constant 0 : index
    %c0_0 = arith.constant 0 : index
    %0 = vector.load %arg5[%c0, %c0_0] : memref<32x8xf32, #tpu.memory_space<vmem>>, vector<32x8xf32>
    %c0_1 = arith.constant 0 : index
    %c0_2 = arith.constant 0 : index
    %1 = vector.load %arg6[%c0_1, %c0_2] : memref<32x1xi32, #tpu.memory_space<vmem>>, vector<32x1xi32>
    %c0_3 = arith.constant 0 : index
    %c0_4 = arith.constant 0 : index
    %2 = vector.load %arg4[%c0_3, %c0_4] : memref<1x128xi32, #tpu.memory_space<vmem>>, vector<1x128xi32>
    %3 = arith.mulf %0, %0 : vector<32x8xf32>
    %cst = arith.constant dense<0.000000e+00> : vector<32xf32>
    %4 = vector.multi_reduction <add>, %3, %cst [1] : vector<32x8xf32> to vector<32xf32>
    %5 = vector.shape_cast %4 : vector<32xf32> to vector<32x1xf32>
    %c0_5 = arith.constant 0 : index
    %c0_6 = arith.constant 0 : index
    %6 = vector.load %arg3[%c0_5, %c0_6] : memref<1x128xf32, #tpu.memory_space<vmem>>, vector<1x128xf32>
    %7 = vector.broadcast %5 : vector<32x1xf32> to vector<32x128xf32>
    %8 = vector.broadcast %6 : vector<1x128xf32> to vector<32x128xf32>
    %9 = arith.addf %7, %8 : vector<32x128xf32>
    %c0_7 = arith.constant 0 : index
    %c0_8 = arith.constant 0 : index
    %10 = vector.load %arg2[%c0_7, %c0_8] : memref<8x128xf32, #tpu.memory_space<vmem>>, vector<8x128xf32>
    %cst_9 = arith.constant dense<0.000000e+00> : vector<32x128xf32>
    %11 = tpu.matmul %0, %10, %cst_9 {dimension_numbers = #tpu.dot_dimension_numbers<[1], [0], [0], [1], [0, 0, 1, 1], [], []>} : vector<32x8xf32>, vector<8x128xf32>, vector<32x128xf32> -> vector<32x128xf32>
    %cst_10 = arith.constant 2.000000e+00 : f32
    %12 = vector.broadcast %cst_10 : f32 to vector<32x128xf32>
    %13 = arith.mulf %12, %11 : vector<32x128xf32>
    %14 = arith.subf %9, %13 : vector<32x128xf32>
    %cst_11 = arith.constant 0.000000e+00 : f32
    %15 = vector.broadcast %cst_11 : f32 to vector<32x128xf32>
    %16 = arith.maximumf %14, %15 : vector<32x128xf32>
    %17 = tpu.iota {dimensions = array<i32: 1>} : vector<1x128xi32>
    %18 = tpu.bitcast %16 : vector<32x128xf32> -> vector<32x128xi32>
    %c-128_i32 = arith.constant -128 : i32
    %19 = vector.broadcast %c-128_i32 : i32 to vector<32x128xi32>
    %20 = arith.andi %18, %19 : vector<32x128xi32>
    %21 = vector.broadcast %17 : vector<1x128xi32> to vector<32x128xi32>
    %22 = arith.ori %20, %21 : vector<32x128xi32>
    %23 = vector.broadcast %1 : vector<32x1xi32> to vector<32x128xi32>
    %24 = vector.broadcast %2 : vector<1x128xi32> to vector<32x128xi32>
    %25 = arith.cmpi eq, %23, %24 : vector<32x128xi32>
    %c2147483647_i32 = arith.constant 2147483647 : i32
    %26 = vector.broadcast %c2147483647_i32 : i32 to vector<32x128xi32>
    %27 = arith.select %25, %22, %26 : vector<32x128xi1>, vector<32x128xi32>
    %cst_12 = arith.constant 0.000000e+00 : f32
    %28 = vector.broadcast %cst_12 : f32 to vector<32x128xf32>
    %cst_13 = arith.constant 0.000000e+00 : f32
    %29 = vector.broadcast %cst_13 : f32 to vector<32x1xf32>
    %cst_14 = arith.constant dense<2147483647> : vector<32xi32>
    %30 = vector.multi_reduction <minsi>, %27, %cst_14 [1] : vector<32x128xi32> to vector<32xi32>
    %31 = vector.shape_cast %30 : vector<32xi32> to vector<32x1xi32>
    %c127_i32 = arith.constant 127 : i32
    %32 = vector.broadcast %c127_i32 : i32 to vector<32x1xi32>
    %33 = arith.andi %31, %32 : vector<32x1xi32>
    %c-128_i32_15 = arith.constant -128 : i32
    %34 = vector.broadcast %c-128_i32_15 : i32 to vector<32x1xi32>
    %35 = arith.andi %31, %34 : vector<32x1xi32>
    %36 = tpu.bitcast %35 : vector<32x1xi32> -> vector<32x1xf32>
    %c2147483647_i32_16 = arith.constant 2147483647 : i32
    %37 = vector.broadcast %c2147483647_i32_16 : i32 to vector<32x1xi32>
    %38 = arith.cmpi slt, %31, %37 : vector<32x1xi32>
    %cst_17 = arith.constant 1.000000e-16 : f32
    %39 = vector.broadcast %cst_17 : f32 to vector<32x1xf32>
    %40 = arith.maximumf %36, %39 : vector<32x1xf32>
    %41 = tpu.reciprocal %40 {approx = true} : vector<32x1xf32> -> vector<32x1xf32>
    %cst_18 = arith.constant 0.000000e+00 : f32
    %42 = vector.broadcast %cst_18 : f32 to vector<32x1xf32>
    %43 = arith.select %38, %41, %42 : vector<32x1xi1>, vector<32x1xf32>
    %44 = vector.broadcast %17 : vector<1x128xi32> to vector<32x128xi32>
    %45 = vector.broadcast %33 : vector<32x1xi32> to vector<32x128xi32>
    %46 = arith.cmpi eq, %44, %45 : vector<32x128xi32>
    %cst_19 = arith.constant 0.000000e+00 : f32
    %47 = vector.shape_cast %43 : vector<32x1xf32> to vector<32x1xf32>
    %48 = vector.broadcast %47 : vector<32x1xf32> to vector<32x128xf32>
    %49 = vector.broadcast %cst_19 : f32 to vector<32x128xf32>
    %50 = arith.select %46, %48, %49 : vector<32x128xi1>, vector<32x128xf32>
    %51 = arith.addf %28, %50 : vector<32x128xf32>
    %52 = arith.addf %29, %43 : vector<32x1xf32>
    %c2147483647_i32_20 = arith.constant 2147483647 : i32
    %53 = vector.broadcast %c2147483647_i32_20 : i32 to vector<32x128xi32>
    %54 = arith.select %46, %53, %27 : vector<32x128xi1>, vector<32x128xi32>
    %cst_21 = arith.constant dense<2147483647> : vector<32xi32>
    %55 = vector.multi_reduction <minsi>, %54, %cst_21 [1] : vector<32x128xi32> to vector<32xi32>
    %56 = vector.shape_cast %55 : vector<32xi32> to vector<32x1xi32>
    %c127_i32_22 = arith.constant 127 : i32
    %57 = vector.broadcast %c127_i32_22 : i32 to vector<32x1xi32>
    %58 = arith.andi %56, %57 : vector<32x1xi32>
    %c-128_i32_23 = arith.constant -128 : i32
    %59 = vector.broadcast %c-128_i32_23 : i32 to vector<32x1xi32>
    %60 = arith.andi %56, %59 : vector<32x1xi32>
    %61 = tpu.bitcast %60 : vector<32x1xi32> -> vector<32x1xf32>
    %c2147483647_i32_24 = arith.constant 2147483647 : i32
    %62 = vector.broadcast %c2147483647_i32_24 : i32 to vector<32x1xi32>
    %63 = arith.cmpi slt, %56, %62 : vector<32x1xi32>
    %cst_25 = arith.constant 1.000000e-16 : f32
    %64 = vector.broadcast %cst_25 : f32 to vector<32x1xf32>
    %65 = arith.maximumf %61, %64 : vector<32x1xf32>
    %66 = tpu.reciprocal %65 {approx = true} : vector<32x1xf32> -> vector<32x1xf32>
    %cst_26 = arith.constant 0.000000e+00 : f32
    %67 = vector.broadcast %cst_26 : f32 to vector<32x1xf32>
    %68 = arith.select %63, %66, %67 : vector<32x1xi1>, vector<32x1xf32>
    %69 = vector.broadcast %17 : vector<1x128xi32> to vector<32x128xi32>
    %70 = vector.broadcast %58 : vector<32x1xi32> to vector<32x128xi32>
    %71 = arith.cmpi eq, %69, %70 : vector<32x128xi32>
    %cst_27 = arith.constant 0.000000e+00 : f32
    %72 = vector.shape_cast %68 : vector<32x1xf32> to vector<32x1xf32>
    %73 = vector.broadcast %72 : vector<32x1xf32> to vector<32x128xf32>
    %74 = vector.broadcast %cst_27 : f32 to vector<32x128xf32>
    %75 = arith.select %71, %73, %74 : vector<32x128xi1>, vector<32x128xf32>
    %76 = arith.addf %51, %75 : vector<32x128xf32>
    %77 = arith.addf %52, %68 : vector<32x1xf32>
    %c2147483647_i32_28 = arith.constant 2147483647 : i32
    %78 = vector.broadcast %c2147483647_i32_28 : i32 to vector<32x128xi32>
    %79 = arith.select %71, %78, %54 : vector<32x128xi1>, vector<32x128xi32>
    %cst_29 = arith.constant dense<2147483647> : vector<32xi32>
    %80 = vector.multi_reduction <minsi>, %79, %cst_29 [1] : vector<32x128xi32> to vector<32xi32>
    %81 = vector.shape_cast %80 : vector<32xi32> to vector<32x1xi32>
    %c127_i32_30 = arith.constant 127 : i32
    %82 = vector.broadcast %c127_i32_30 : i32 to vector<32x1xi32>
    %83 = arith.andi %81, %82 : vector<32x1xi32>
    %c-128_i32_31 = arith.constant -128 : i32
    %84 = vector.broadcast %c-128_i32_31 : i32 to vector<32x1xi32>
    %85 = arith.andi %81, %84 : vector<32x1xi32>
    %86 = tpu.bitcast %85 : vector<32x1xi32> -> vector<32x1xf32>
    %c2147483647_i32_32 = arith.constant 2147483647 : i32
    %87 = vector.broadcast %c2147483647_i32_32 : i32 to vector<32x1xi32>
    %88 = arith.cmpi slt, %81, %87 : vector<32x1xi32>
    %cst_33 = arith.constant 1.000000e-16 : f32
    %89 = vector.broadcast %cst_33 : f32 to vector<32x1xf32>
    %90 = arith.maximumf %86, %89 : vector<32x1xf32>
    %91 = tpu.reciprocal %90 {approx = true} : vector<32x1xf32> -> vector<32x1xf32>
    %cst_34 = arith.constant 0.000000e+00 : f32
    %92 = vector.broadcast %cst_34 : f32 to vector<32x1xf32>
    %93 = arith.select %88, %91, %92 : vector<32x1xi1>, vector<32x1xf32>
    %94 = vector.broadcast %17 : vector<1x128xi32> to vector<32x128xi32>
    %95 = vector.broadcast %83 : vector<32x1xi32> to vector<32x128xi32>
    %96 = arith.cmpi eq, %94, %95 : vector<32x128xi32>
    %cst_35 = arith.constant 0.000000e+00 : f32
    %97 = vector.shape_cast %93 : vector<32x1xf32> to vector<32x1xf32>
    %98 = vector.broadcast %97 : vector<32x1xf32> to vector<32x128xf32>
    %99 = vector.broadcast %cst_35 : f32 to vector<32x128xf32>
    %100 = arith.select %96, %98, %99 : vector<32x128xi1>, vector<32x128xf32>
    %101 = arith.addf %76, %100 : vector<32x128xf32>
    %102 = arith.addf %77, %93 : vector<32x1xf32>
    %c0_36 = arith.constant 0 : index
    %c0_37 = arith.constant 0 : index
    %103 = vector.load %arg1[%c0_36, %c0_37] : memref<128x8xf32, #tpu.memory_space<vmem>>, vector<128x8xf32>
    %cst_38 = arith.constant dense<0.000000e+00> : vector<32x8xf32>
    %104 = tpu.matmul %101, %103, %cst_38 {dimension_numbers = #tpu.dot_dimension_numbers<[1], [0], [0], [1], [0, 0, 1, 1], [], []>} : vector<32x128xf32>, vector<128x8xf32>, vector<32x8xf32> -> vector<32x8xf32>
    %cst_39 = arith.constant 0.000000e+00 : f32
    %105 = vector.broadcast %cst_39 : f32 to vector<32x1xf32>
    %106 = arith.cmpf ogt, %102, %105 : vector<32x1xf32>
    %107 = tpu.reciprocal %102 {approx = true} : vector<32x1xf32> -> vector<32x1xf32>
    %cst_40 = arith.constant 0.000000e+00 : f32
    %108 = vector.broadcast %cst_40 : f32 to vector<32x1xf32>
    %109 = arith.select %106, %107, %108 : vector<32x1xi1>, vector<32x1xf32>
    %110 = vector.broadcast %109 : vector<32x1xf32> to vector<32x8xf32>
    %111 = arith.mulf %104, %110 : vector<32x8xf32>
    %c0_41 = arith.constant 0 : index
    %c0_42 = arith.constant 0 : index
    %112 = vector.load %arg8[%c0_41, %c0_42] : memref<8x128xf32, #tpu.memory_space<vmem>>, vector<8x128xf32>
    %cst_43 = arith.constant dense<0.000000e+00> : vector<32x128xf32>
    %113 = tpu.matmul %111, %112, %cst_43 {dimension_numbers = #tpu.dot_dimension_numbers<[1], [0], [0], [1], [0, 0, 1, 1], [], []>} : vector<32x8xf32>, vector<8x128xf32>, vector<32x128xf32> -> vector<32x128xf32>
    %c0_44 = arith.constant 0 : index
    %c0_45 = arith.constant 0 : index
    %114 = vector.load %arg7[%c0_44, %c0_45] : memref<32x8xf32, #tpu.memory_space<vmem>>, vector<32x8xf32>
    %c0_46 = arith.constant 0 : index
    %c0_47 = arith.constant 0 : index
    %115 = vector.load %arg9[%c0_46, %c0_47] : memref<8x128xf32, #tpu.memory_space<vmem>>, vector<8x128xf32>
    %cst_48 = arith.constant dense<0.000000e+00> : vector<32x128xf32>
    %116 = tpu.matmul %114, %115, %cst_48 {dimension_numbers = #tpu.dot_dimension_numbers<[1], [0], [0], [1], [0, 0, 1, 1], [], []>} : vector<32x8xf32>, vector<8x128xf32>, vector<32x128xf32> -> vector<32x128xf32>
    %117 = arith.addf %113, %116 : vector<32x128xf32>
    %c0_49 = arith.constant 0 : index
    %c0_50 = arith.constant 0 : index
    %118 = vector.load %arg10[%c0_49, %c0_50] : memref<1x128xf32, #tpu.memory_space<vmem>>, vector<1x128xf32>
    %119 = vector.broadcast %118 : vector<1x128xf32> to vector<32x128xf32>
    %120 = arith.addf %117, %119 : vector<32x128xf32>
    %cst_51 = arith.constant 0.000000e+00 : f32
    %121 = vector.broadcast %cst_51 : f32 to vector<32x128xf32>
    %122 = arith.maximumf %120, %121 : vector<32x128xf32>
    %c0_52 = arith.constant 0 : index
    %c0_53 = arith.constant 0 : index
    %123 = vector.load %arg11[%c0_52, %c0_53] : memref<1x128xf32, #tpu.memory_space<vmem>>, vector<1x128xf32>
    %124 = vector.broadcast %123 : vector<1x128xf32> to vector<32x128xf32>
    %125 = arith.mulf %122, %124 : vector<32x128xf32>
    %c0_54 = arith.constant 0 : index
    %c0_55 = arith.constant 0 : index
    %126 = vector.load %arg12[%c0_54, %c0_55] : memref<1x128xf32, #tpu.memory_space<vmem>>, vector<1x128xf32>
    %127 = vector.broadcast %126 : vector<1x128xf32> to vector<32x128xf32>
    %128 = arith.addf %125, %127 : vector<32x128xf32>
    %c0_56 = arith.constant 0 : index
    %c0_57 = arith.constant 0 : index
    %129 = vector.load %arg13[%c0_56, %c0_57] : memref<32x128xf32, #tpu.memory_space<vmem>>, vector<32x128xf32>
    tpu.vector_store %arg13[%c0_56, %c0_57], %128 {strides = array<i32>} : memref<32x128xf32, #tpu.memory_space<vmem>>, vector<32x128xf32>,
    return
  }
  func.func @transform_0(%arg0: i32) -> (i32, i32) {
    %c0_i32 = arith.constant 0 : i32
    %c0_i32_0 = arith.constant 0 : i32
    %c0_i32_1 = arith.constant 0 : i32
    return %c0_i32, %c0_i32_0 : i32, i32
  }
  func.func @transform_1(%arg0: i32) -> (i32, i32) {
    %c0_i32 = arith.constant 0 : i32
    %c0_i32_0 = arith.constant 0 : i32
    %c0_i32_1 = arith.constant 0 : i32
    return %c0_i32, %c0_i32_0 : i32, i32
  }
  func.func @transform_2(%arg0: i32) -> (i32, i32) {
    %c0_i32 = arith.constant 0 : i32
    %c0_i32_0 = arith.constant 0 : i32
    %c0_i32_1 = arith.constant 0 : i32
    return %c0_i32, %c0_i32_0 : i32, i32
  }
  func.func @transform_3(%arg0: i32) -> (i32, i32) {
    %c0_i32 = arith.constant 0 : i32
    %c0_i32_0 = arith.constant 0 : i32
    %c0_i32_1 = arith.constant 0 : i32
    return %c0_i32, %c0_i32_0 : i32, i32
  }
  func.func @transform_4(%arg0: i32) -> (i32, i32) {
    %c0_i32 = arith.constant 0 : i32
    %c0_i32_0 = arith.constant 0 : i32
    return %arg0, %c0_i32 : i32, i32
  }
  func.func @transform_5(%arg0: i32) -> (i32, i32) {
    %c0_i32 = arith.constant 0 : i32
    %c0_i32_0 = arith.constant 0 : i32
    return %arg0, %c0_i32 : i32, i32
  }
  func.func @transform_6(%arg0: i32) -> (i32, i32) {
    %c0_i32 = arith.constant 0 : i32
    %c0_i32_0 = arith.constant 0 : i32
    return %arg0, %c0_i32 : i32, i32
  }
  func.func @transform_7(%arg0: i32) -> (i32, i32) {
    %c0_i32 = arith.constant 0 : i32
    %c0_i32_0 = arith.constant 0 : i32
    %c0_i32_1 = arith.constant 0 : i32
    return %c0_i32, %c0_i32_0 : i32, i32
  }
  func.func @transform_8(%arg0: i32) -> (i32, i32) {
    %c0_i32 = arith.constant 0 : i32
    %c0_i32_0 = arith.constant 0 : i32
    %c0_i32_1 = arith.constant 0 : i32
    return %c0_i32, %c0_i32_0 : i32, i32
  }
  func.func @transform_9(%arg0: i32) -> (i32, i32) {
    %c0_i32 = arith.constant 0 : i32
    %c0_i32_0 = arith.constant 0 : i32
    %c0_i32_1 = arith.constant 0 : i32
    return %c0_i32, %c0_i32_0 : i32, i32
  }
  func.func @transform_10(%arg0: i32) -> (i32, i32) {
    %c0_i32 = arith.constant 0 : i32
    %c0_i32_0 = arith.constant 0 : i32
    %c0_i32_1 = arith.constant 0 : i32
    return %c0_i32, %c0_i32_0 : i32, i32
  }
  func.func @transform_11(%arg0: i32) -> (i32, i32) {
    %c0_i32 = arith.constant 0 : i32
    %c0_i32_0 = arith.constant 0 : i32
    %c0_i32_1 = arith.constant 0 : i32
    return %c0_i32, %c0_i32_0 : i32, i32
  }
  func.func @transform_12(%arg0: i32) -> (i32, i32) {
    %c0_i32 = arith.constant 0 : i32
    %c0_i32_0 = arith.constant 0 : i32
    return %arg0, %c0_i32 : i32, i32
  }
}

</mosaic_0001>

<bundles_post_ra>
// kernel: tpu_custom_call.1
= control target key start
LH: loop header
LB: loop body
LE: loop exit
PB: predicated region body
PF: predicated region fallthrough
CT: control target
= control target key end

     0   :  { %s2241_s0 = inlined_call_operand.vmem [shape: f32[128,8], index: 0, kind: input, shape index: {}]   ;;  %s2242_s1 = inlined_call_operand.vmem [shape: f32[8,128], index: 1, kind: input, shape index: {}]   ;;  %s2243_s2 = inlined_call_operand.vmem [shape: f32[1,128], index: 2, kind: input, shape index: {}]   ;;  %s2244_s3 = inlined_call_operand.vmem [shape: s32[1,128], index: 3, kind: input, shape index: {}]   ;;  %s2245_s4 = inlined_call_operand.vmem [shape: f32[64,8], index: 4, kind: input, shape index: {}]   ;;  %s2246_s5 = inlined_call_operand.vmem [shape: s32[64,1], index: 5, kind: input, shape index: {}]   ;;  %s2247_s6 = inlined_call_operand.vmem [shape: f32[64,8], index: 6, kind: input, shape index: {}]   ;;  %s2248_s7 = inlined_call_operand.vmem [shape: f32[8,128], index: 7, kind: input, shape index: {}]   ;;  %s2249_s8 = inlined_call_operand.vmem [shape: f32[8,128], index: 8, kind: input, shape index: {}]   ;;  %s2250_s9 = inlined_call_operand.vmem [shape: f32[1,128], index: 9, kind: input, shape index: {}]   ;;  %s2251_s10 = inlined_call_operand.vmem [shape: f32[1,128], index: 10, kind: input, shape index: {}]   ;;  %s2252_s11 = inlined_call_operand.vmem [shape: f32[1,128], index: 11, kind: input, shape index: {}]   ;;  %s2253_s12 = inlined_call_operand.hbm [shape: f32[64,128], index: 12, kind: output, shape index: {}]  }
   0x1   :  { %2254 = sst [smem:[#allocation5_spill]] %s2242_s1 }
   0x2   :  { %2255 = sst [smem:[#allocation6_spill]] %s2243_s2 }
   0x3   :  { %17 = vsyncpa [#allocation3], 0 }
   0x4   :  { %19 = vsyncpa [#allocation3 + $0x1], 0  ;;  %s1786_s21 = smov 0   ;;  %s1788_s22 = smov 0  }
   0x5   :  { %s1790_s23 = smov 0   ;;  %s1792_s24 = smov 0  }
   0x6 LB: > { %s1807_s25 = sadd.s32 4294967295, %s1715_s24   ;;  %s1410_s26 = sadd.s32 4294967294, %s1715_s24   ;;  %s1715_s24 = sphi %s1792_s24, %s2279_s24   ;;  %s1711_s23 = sphi %s1790_s23, %s2278_s23   ;;  %s1707_s22 = sphi %s1788_s22, %s2277_s22   ;;  %s1703_s21 = sphi %s1786_s21, %s2276_s21  }
   0x7   : > { %s1811_s27 = sadd.s32 1, %s1715_s24   ;;  %s299_s28 = sadd.s32 1, %s1711_s23 }
   0x8   : > { %s296_s29 = ssub.s32 %s1715_s24, %s1811_s27  ;;  %p309_p0 = scmp.ne.s32.totalorder %s1711_s23, %s1707_s22 }
   0x9   : > { %p297_p1 = scmp.eq.s32.totalorder %s296_s29, 0  ;;  %p310_p2 = scmp.eq.s32.totalorder %s1807_s25, 1 }
   0xa   : > { %p315_p3 = scmp.ne.s32.totalorder %s1707_s22, %s1703_s21  ;;  %p316_p4 = scmp.eq.s32.totalorder %s1410_s26, 1 }
   0xb   : > { %s1822_s30 = scalar_select %p297_p1, %s1711_s23, %s299_s28  }
   0xc   : > { %p1824_p5 = por %p310_p2, %p309_p0  ;;  %p1828_p6 = por %p316_p4, %p315_p3 }
   0xd   : > { %p1413_p7 = scmp.ge.s32.totalorder %s1715_s24, 1  ;;  %p388_p8 = scmp.lt.s32.totalorder %s1715_s24, 3 }
   0xf   : > { %p389_p9 = pnand %p1413_p7, %p388_p8 }
  0x10   : > { %s2258_s1 = sld [smem:[#allocation5_spill]] (!%p389_p9)  ;;  %s1415_s17 = sshll.u32 (!%p389_p9), %s1807_s25, 2  ;;  %v1717_v1 = vmov (!%p389_p9), 0   ;;  %vm472_vm0 = vcmask (!%p389_p9), 64512   ;;  %v606_v28 = vlaneseq (!%p389_p9)  ;;  %v1426_v36 = vld [vmem:[%s2244_s3] ss:$0 sm:$0xff] (!%p389_p9) }
  0x11   : > { %392 = sbr.rel (%p389_p9) target bundleno = 1622 (0x656), region = 68  ;;  %p441_p10 = scmp.lt.s32.totalorder (!%p389_p9), %s1415_s17, 7  ;;  %1620 = vset.pattern.permute.xlu1 (!%p389_p9), %v1717_v1  ;;  %1619 = vset.pattern.permute.xlu0 (!%p389_p9), %v1717_v1 }
  0x12   : > { %s2259_s2 = sld [smem:[#allocation6_spill]] (!%p389_p9)  ;;  %v1862_v37 = vand.u32 (!%p389_p9), 127, %v606_v28  ;;  %s437_s16 = sand.u32 (!%p389_p9), 1, %s1707_s22  }
  0x13   : > { %s1443_s29 = sshll.u32 (!%p389_p9), %s1807_s25, 9 }
  0x16   : > { %v496_v0 = vld [vmem:[%s2258_s1] sm:$0xff] (!%p389_p9)  ;;  %s2200_s1 = scalar_lea.sflag (!%p389_p9), [#allocation3], %s437_s16 }
  0x17   : > { %1479 = vmatprep.subr.mxu0 (!%p389_p9), %v496_v0 }
  0x18   : > { %1480 = vmatpush3.msra.mxu0 %v496_v0  ;;  %s2281_s17 = smov (!%p441_p10, %s1415_s17), 7  ;;  %v1421_v22 = vld [vmem:[%s2259_s2] ss:$0 sm:$0xff]  ;;  %s1414_s2 = sshll.u32 %s437_s16, 5 }
  0x19   : > { %s1838_s18 = sshll.u32 %s2281_s17, 3  ;;  %s2194_s17 = scalar_lea.hbm %s2253_s12, %s1443_s29 }
  0x1a   : > { %s444_s26 = scalar_lea.vmem %s2245_s4, %s1838_s18  ;;  %s450_s15 = scalar_lea.vmem %s2246_s5, %s1838_s18 }
  0x1b   : > { %v459_v2 = vld [vmem:[%s444_s26] sm:$0xff]  ;;  %v460_v3 = vld [vmem:[%s444_s26 + $0x8] sm:$0xff]  ;;  %v461_v4 = vld [vmem:[%s444_s26 + $0x10] sm:$0xff] }
  0x1c   : > { %v468_v5 = vmul.f32 %v459_v2, %v459_v2  ;;  %1481 = vmatprep.mubr.msk.f32.mxu0 %vm472_vm0, %v459_v2  ;;  %v462_v6 = vld [vmem:[%s444_s26 + $0x18] sm:$0xff]  ;;  %v470_v7 = vmul.f32 %v461_v4, %v461_v4  ;;  %v469_v8 = vmul.f32 %v460_v3, %v460_v3  ;;  %v464_v14 = vld [vmem:[%s450_s15 + $0x8] sm:$0xff]  ;;  %v465_v15 = vld [vmem:[%s450_s15 + $0x10] sm:$0xff]  ;;  %s2141_s26 = scalar_lea.vmem %s2247_s6, %s1838_s18 }
  0x1d   : > { %1482 = vmatmul.mubr.msk.f32.vlgmr.msra.gmra.mrb[0].mxu0 %vm472_vm0, %v460_v3  ;;  %v471_v9 = vmul.f32 %v462_v6, %v462_v6  ;;  %v463_v16 = vld [vmem:[%s450_s15] sm:$0xff]  ;;  %v466_v17 = vld [vmem:[%s450_s15 + $0x18] sm:$0xff] }
  0x1e   : > { %1484 = vmatprep.mubr.msk.f32.mxu0 %vm472_vm0, %v461_v4  ;;  %v479_v10 = vsel %vm472_vm0, %v470_v7, 0.0  ;;  %v473_v11 = vsel %vm472_vm0, %v468_v5, 0.0  ;;  %v476_v13 = vsel %vm472_vm0, %v469_v8, 0.0 }
  0x1f   : > { %480 = vadd.xlane.f32.xlu1 %v479_v10  ;;  %474 = vadd.xlane.f32.xlu0 %v473_v11  ;;  %v482_v12 = vsel %vm472_vm0, %v471_v9, 0.0 }
  0x21   : > { %1485 = vmatmul.mubr.msk.f32.gmra.mrb[2].mxu0 %vm472_vm0, %v462_v6 }
  0x23   : > { %483 = vadd.xlane.f32.xlu1 %v482_v12  ;;  %477 = vadd.xlane.f32.xlu0 %v476_v13 }
  0x34   : > { %624 = vperm.xlu1 %1620, %v464_v14  }
  0x38   : > { %627 = vperm.xlu1 %1620, %v465_v15  }
  0x39   : > { %621 = vperm.xlu0 %1619, %v463_v16  }
  0x3c   : > { %630 = vperm.xlu1 %1620, %v466_v17  }
  0xac   : > { %v481_v18 = vpop.xlane.xlu1 %480  ;;  %v475_v19 = vpop.xlane.xlu0 %474 }
  0xad   : > { %v492_v29 = vadd.f32 %v1421_v22, %v475_v19  ;;  %v494_v40 = vadd.f32 %v1421_v22, %v481_v18 }
  0xb0   : > { %v484_v20 = vpop.xlane.xlu1 %483  ;;  %v478_v21 = vpop.xlane.xlu0 %477 }
  0xb1   : > { %v493_v23 = vadd.f32 %v1421_v22, %v478_v21  ;;  %v495_v31 = vadd.f32 %v1421_v22, %v484_v20 }
  0xb4   : > { %v625_v25 = vpop.permute.xlu1 %624 }
  0xb5   : > { %vm637_vm1 = vcmp.eq.s32.totalorder %v625_v25, %v1426_v36 }
  0xb8   : > { %v628_v43 = vpop.permute.xlu1 %627  ;;  %v622_v44 = vpop.permute.xlu0 %621 }
  0xb9   : > { %vm636_vm2 = vcmp.eq.s32.totalorder %v622_v44, %v1426_v36  ;;  %vm638_vm3 = vcmp.eq.s32.totalorder %v628_v43, %v1426_v36 }
  0xbc   : > { %v631_v56 = vpop.permute.xlu1 %630 }
  0xbd   : > { %vm639_vm4 = vcmp.eq.s32.totalorder %v631_v56, %v1426_v36 }
  0xf0   : > { %v1483_v24 = vpop.f32.mrb[0].mxu0 }
  0xf1   : > { %v595_v26 = vmul.f32 2.0, %v1483_v24  ;;  %v575_v27 = vpop.f32.mrb[1].mxu0 }
  0xf2   : > { %v594_v30 = vmul.f32 2.0, %v575_v27 }
  0xf3   : > { %v599_v32 = vsub.f32 %v493_v23, %v595_v26 }
  0xf4   : > { %v598_v33 = vsub.f32 %v492_v29, %v594_v30  ;;  %v1486_v34 = vpop.f32.mrb[2].mxu0 }
  0xf5   : > { %v603_v35 = vmax.f32 %v599_v32, 0.0  ;;  %v597_v38 = vmul.f32 2.0, %v1486_v34  ;;  %v585_v39 = vpop.f32.mrb[3].mxu0 }
  0xf6   : > { %v602_v41 = vmax.f32 %v598_v33, 0.0  ;;  %v596_v42 = vmul.f32 2.0, %v585_v39 }
  0xf7   : > { %v613_v45 = vand.u32 4294967168, %v603_v35  ;;  %v601_v46 = vsub.f32 %v495_v31, %v597_v38 }
  0xf8   : > { %v612_v47 = vand.u32 4294967168, %v602_v41  ;;  %v600_v48 = vsub.f32 %v494_v40, %v596_v42 }
  0xf9   : > { %v617_v49 = vor.u32 %v613_v45, %v1862_v37  ;;  %v605_v50 = vmax.f32 %v601_v46, 0.0 }
  0xfa   : > { %v604_v51 = vmax.f32 %v600_v48, 0.0  ;;  %v616_v52 = vor.u32 %v612_v47, %v1862_v37 }
  0xfb   : > { %v1866_v53 = vsel %vm637_vm1, %v617_v49, 2147483647  ;;  %v615_v54 = vand.u32 4294967168, %v605_v50 }
  0xfc   : > { %v614_v55 = vand.u32 4294967168, %v604_v51  ;;  %v640_v57 = vsel %vm636_vm2, %v616_v52, 2147483647  ;;  %v659_v58 = vshra.s32 %v1866_v53, 16  ;;  %v658_v11 = vand.u32 65535, %v1866_v53 }
  0xfd   : > { %v619_v59 = vor.u32 %v615_v54, %v1862_v37  ;;  %v645_v60 = vshra.s32 %v640_v57, 16  ;;  %v644_v6 = vand.u32 65535, %v640_v57 }
  0xfe   : > { %v618_v61 = vor.u32 %v614_v55, %v1862_v37  ;;  %v661_v62 = vcvt.s32.f32 %v659_v58  ;;  %v660_v15 = vcvt.s32.f32 %v658_v11 }
  0xff   : > { %v647_v63 = vcvt.s32.f32 %v645_v60  ;;  %v1873_v1 = vsel %vm639_vm4, %v619_v59, 2147483647  ;;  %v646_v9 = vcvt.s32.f32 %v644_v6 }
 0x100   : > { %v1871_v0 = vsel %vm638_vm3, %v618_v61, 2147483647  ;;  %662 = vmin.xlane.f32.xlu0 %v661_v62  ;;  %v687_v4 = vshra.s32 %v1873_v1, 16  ;;  %v686_v16 = vand.u32 65535, %v1873_v1 }
 0x101   : > { %648 = vmin.xlane.f32.xlu1 %v647_v63  ;;  %v673_v2 = vshra.s32 %v1871_v0, 16  ;;  %v672_v10 = vand.u32 65535, %v1871_v0 }
 0x102   : > { %v689_v5 = vcvt.s32.f32 %v687_v4  ;;  %v688_v20 = vcvt.s32.f32 %v686_v16 }
 0x103   : > { %v675_v3 = vcvt.s32.f32 %v673_v2  ;;  %v674_v14 = vcvt.s32.f32 %v672_v10 }
 0x105   : > { %676 = vmin.xlane.f32.xlu1 %v675_v3 }
 0x109   : > { %690 = vmin.xlane.f32.xlu1 %v689_v5 }
 0x18d   : > { %v663_v7 = vpop.xlane.xlu0 %662 }
 0x18e   : > { %v649_v8 = vpop.xlane.xlu1 %648  ;;  %vm664_vm6 = vcmp.eq.f32.partialorder %v661_v62, %v663_v7  ;;  %v669_v23 = vcvt.f32.s32 %v663_v7 }
 0x18f   : > { %vm650_vm5 = vcmp.eq.f32.partialorder %v647_v63, %v649_v8  ;;  %v665_v18 = vsel %vm664_vm6, %v660_v15, inf  ;;  %v655_v22 = vcvt.f32.s32 %v649_v8 }
 0x190   : > { %v651_v12 = vsel %vm650_vm5, %v646_v9, inf  ;;  %v670_v29 = vshll.u32 %v669_v23, 16 }
 0x191   : > { %652 = vmin.xlane.f32.xlu1 %v651_v12  ;;  %v656_v25 = vshll.u32 %v655_v22, 16 }
 0x192   : > { %v677_v13 = vpop.xlane.xlu1 %676 }
 0x193   : > { %vm678_vm7 = vcmp.eq.f32.partialorder %v675_v3, %v677_v13  ;;  %v683_v26 = vcvt.f32.s32 %v677_v13 }
 0x194   : > { %v679_v17 = vsel %vm678_vm7, %v674_v14, inf }
 0x195   : > { %680 = vmin.xlane.f32.xlu0 %v679_v17  ;;  %666 = vmin.xlane.f32.xlu1 %v665_v18  ;;  %v684_v32 = vshll.u32 %v683_v26, 16 }
 0x196   : > { %v691_v19 = vpop.xlane.xlu1 %690 }
 0x197   : > { %vm692_vm8 = vcmp.eq.f32.partialorder %v689_v5, %v691_v19  ;;  %v697_v36 = vcvt.f32.s32 %v691_v19 }
 0x198   : > { %v693_v21 = vsel %vm692_vm8, %v688_v20, inf }
 0x199   : > { %694 = vmin.xlane.f32.xlu1 %v693_v21  ;;  %v698_v44 = vshll.u32 %v697_v36, 16 }
 0x21e   : > { %v653_v24 = vpop.xlane.xlu1 %652 }
 0x21f   : > { %v654_v27 = vcvt.f32.s32 %v653_v24 }
 0x221   : > { %v1880_v28 = vadd.s32 %v656_v25, %v654_v27 }
 0x222   : > { %v667_v30 = vpop.xlane.xlu1 %666  ;;  %v681_v31 = vpop.xlane.xlu0 %680 }
 0x223   : > { %v700_v33 = vand.u32 127, %v1880_v28  ;;  %v668_v34 = vcvt.f32.s32 %v667_v30  ;;  %v682_v35 = vcvt.f32.s32 %v681_v31  ;;  %v704_v15 = vand.u32 4294967168, %v1880_v28 }
 0x224   : > { %vm712_vm6 = vcmp.lt.s32.totalorder %v1880_v28, 2147483647 }
 0x225   : > { %v1883_v38 = vadd.s32 %v670_v29, %v668_v34  ;;  %v1885_v39 = vadd.s32 %v684_v32, %v682_v35  ;;  %vm1888_vm9 = vcmp.eq.s32.totalorder %v1862_v37, %v700_v33  ;;  %v716_v19 = vmax.f32 %v704_v15, 1e-16  ;;  %v963_v15 = vld [vmem:[%s2241_s0 + $0x58] sm:$0xff] }
 0x226   : > { %v695_v41 = vpop.xlane.xlu1 %694  ;;  %v1894_v42 = vsel %vm1888_vm9, 2147483647, %v640_v57 }
 0x227   : > { %v701_v43 = vand.u32 127, %v1883_v38  ;;  %v702_v45 = vand.u32 127, %v1885_v39  ;;  %v696_v46 = vcvt.f32.s32 %v695_v41  ;;  %v749_v47 = vshra.s32 %v1894_v42, 16 }
 0x228   : > { %v748_v63 = vand.u32 65535, %v1894_v42  ;;  %v705_v16 = vand.u32 4294967168, %v1883_v38  ;;  %v706_v18 = vand.u32 4294967168, %v1885_v39  ;;  %1621 = vrcp.f32 %v716_v19 }
 0x229   : > { %vm1900_vm10 = vcmp.eq.s32.totalorder %v1862_v37, %v701_v43  ;;  %v1904_v49 = vadd.s32 %v698_v44, %v696_v46  ;;  %vm1912_vm11 = vcmp.eq.s32.totalorder %v1862_v37, %v702_v45  ;;  %v751_v52 = vcvt.s32.f32 %v749_v47 }
 0x22a   : > { %v1909_v50 = vsel %vm1900_vm10, 2147483647, %v1866_v53  ;;  %v1920_v55 = vsel %vm1912_vm11, 2147483647, %v1871_v0  ;;  %v750_v3 = vcvt.s32.f32 %v748_v63  ;;  %v717_v21 = vmax.f32 %v705_v16, 1e-16 }
 0x22b   : > { %v763_v54 = vshra.s32 %v1909_v50, 16  ;;  %v703_v56 = vand.u32 127, %v1904_v49  ;;  %752 = vmin.xlane.f32.xlu0 %v751_v52  ;;  %v777_v53 = vshra.s32 %v1920_v55, 16  ;;  %v762_v0 = vand.u32 65535, %v1909_v50 }
 0x22c   : > { %v776_v4 = vand.u32 65535, %v1920_v55  ;;  %v718_v26 = vmax.f32 %v706_v18, 1e-16  ;;  %v707_v27 = vand.u32 4294967168, %v1904_v49  ;;  %1623 = vrcp.f32 %v717_v21 }
 0x22d   : > { %v765_v57 = vcvt.s32.f32 %v763_v54  ;;  %vm1925_vm12 = vcmp.eq.s32.totalorder %v1862_v37, %v703_v56  ;;  %v779_v59 = vcvt.s32.f32 %v777_v53  ;;  %v764_v7 = vcvt.s32.f32 %v762_v0 }
 0x22e   : > { %v1932_v60 = vsel %vm1925_vm12, 2147483647, %v1873_v1  ;;  %v778_v10 = vcvt.s32.f32 %v776_v4  ;;  %1625 = vrcp.f32 %v718_v26  ;;  %v719_v45 = vmax.f32 %v707_v27, 1e-16 }
 0x22f   : > { %766 = vmin.xlane.f32.xlu1 %v765_v57  ;;  %v791_v61 = vshra.s32 %v1932_v60, 16  ;;  %780 = vmin.xlane.f32.xlu0 %v779_v59  ;;  %v790_v1 = vand.u32 65535, %v1932_v60  ;;  %vm713_vm7 = vcmp.lt.s32.totalorder %v1883_v38, 2147483647 }
 0x231   : > { %v793_v62 = vcvt.s32.f32 %v791_v61  ;;  %v792_v13 = vcvt.s32.f32 %v790_v1 }
 0x233   : > { %794 = vmin.xlane.f32.xlu1 %v793_v62 }
 0x2b8   : > { %v753_v2 = vpop.xlane.xlu0 %752 }
 0x2b9   : > { %vm754_vm13 = vcmp.eq.f32.partialorder %v751_v52, %v753_v2  ;;  %v759_v17 = vcvt.f32.s32 %v753_v2 }
 0x2ba   : > { %v755_v5 = vsel %vm754_vm13, %v750_v3, inf  ;;  %vm714_vm13 = vcmp.lt.s32.totalorder %v1885_v39, 2147483647 }
 0x2bb   : > { %756 = vmin.xlane.f32.xlu0 %v755_v5  ;;  %v760_v24 = vshll.u32 %v759_v17, 16 }
 0x2bc   : > { %v767_v6 = vpop.xlane.xlu1 %766  ;;  %v781_v8 = vpop.xlane.xlu0 %780 }
 0x2bd   : > { %vm768_vm14 = vcmp.eq.f32.partialorder %v765_v57, %v767_v6  ;;  %vm782_vm15 = vcmp.eq.f32.partialorder %v779_v59, %v781_v8  ;;  %v773_v20 = vcvt.f32.s32 %v767_v6  ;;  %v787_v22 = vcvt.f32.s32 %v781_v8 }
 0x2be   : > { %v769_v9 = vsel %vm768_vm14, %v764_v7, inf  ;;  %v783_v11 = vsel %vm782_vm15, %v778_v10, inf  ;;  %v1622_v10 = vpop.eup %1621  ;;  %vm715_vm15 = vcmp.lt.s32.totalorder %v1904_v49, 2147483647 }
 0x2bf   : > { %770 = vmin.xlane.f32.xlu1 %v769_v9  ;;  %784 = vmin.xlane.f32.xlu0 %v783_v11  ;;  %v774_v30 = vshll.u32 %v773_v20, 16  ;;  %v788_v33 = vshll.u32 %v787_v22, 16  ;;  %v2011_v20 = vsel %vm712_vm6, %v1622_v10, 0.0  ;;  %v959_v10 = vld [vmem:[%s2241_s0 + $0x38] sm:$0xff] }
 0x2c0   : > { %v795_v12 = vpop.xlane.xlu1 %794  ;;  %v732_v28 = vsel %vm1888_vm9, %v2011_v20, 0.0 }
 0x2c1   : > { %vm796_vm1 = vcmp.eq.f32.partialorder %v793_v62, %v795_v12  ;;  %v801_v34 = vcvt.f32.s32 %v795_v12 }
 0x2c2   : > { %v797_v14 = vsel %vm796_vm1, %v792_v13, inf }
 0x2c3   : > { %798 = vmin.xlane.f32.xlu1 %v797_v14  ;;  %v802_v57 = vshll.u32 %v801_v34, 16 }
 0x348   : > { %v757_v23 = vpop.xlane.xlu0 %756 }
 0x349   : > { %v758_v25 = vcvt.f32.s32 %v757_v23 }
 0x34b   : > { %v1943_v31 = vadd.s32 %v760_v24, %v758_v25 }
 0x34c   : > { %v771_v29 = vpop.xlane.xlu1 %770  ;;  %v785_v35 = vpop.xlane.xlu0 %784 }
 0x34d   : > { %v772_v32 = vcvt.f32.s32 %v771_v29  ;;  %v808_v36 = vand.u32 4294967168, %v1943_v31  ;;  %v786_v43 = vcvt.f32.s32 %v785_v35  ;;  %v804_v44 = vand.u32 127, %v1943_v31 }
 0x34e   : > { %vm816_vm8 = vcmp.lt.s32.totalorder %v1943_v31, 2147483647 }
 0x34f   : > { %v1946_v41 = vadd.s32 %v774_v30, %v772_v32  ;;  %v820_v46 = vmax.f32 %v808_v36, 1e-16  ;;  %v1950_v52 = vadd.s32 %v788_v33, %v786_v43  ;;  %vm1953_vm2 = vcmp.eq.s32.totalorder %v1862_v37, %v804_v44  ;;  %v952_v43 = vld [vmem:[%s2241_s0] sm:$0xff]  ;;  %v953_v44 = vld [vmem:[%s2241_s0 + $0x8] sm:$0xff] }
 0x350   : > { %v799_v54 = vpop.xlane.xlu1 %798  ;;  %v1960_v59 = vsel %vm1953_vm2, 2147483647, %v1894_v42  ;;  %v1541_v58 = vpack.c.bf16 %v953_v44, %v952_v43 }
 0x351   : > { %v809_v47 = vand.u32 4294967168, %v1946_v41  ;;  %v800_v53 = vcvt.f32.s32 %v799_v54  ;;  %v805_v61 = vand.u32 127, %v1946_v41  ;;  %1627 = vrcp.f32 %v820_v46  ;;  %v955_v46 = vld [vmem:[%s2241_s0 + $0x18] sm:$0xff] }
 0x352   : > { %v810_v63 = vand.u32 4294967168, %v1950_v52  ;;  %v853_v0 = vshra.s32 %v1960_v59, 16  ;;  %1629 = vrcp.f32 %v719_v45  ;;  %v806_v4 = vand.u32 127, %v1950_v52  ;;  %v954_v45 = vld [vmem:[%s2241_s0 + $0x10] sm:$0xff]  ;;  %1542 = vmatprep.subr.bf16.mxu1 %v1541_v58 }
 0x353   : > { %v821_v62 = vmax.f32 %v809_v47, 1e-16  ;;  %v803_v2 = vadd.s32 %v802_v57, %v800_v53  ;;  %vm1966_vm3 = vcmp.eq.s32.totalorder %v1862_v37, %v805_v61  ;;  %vm817_vm14 = vcmp.lt.s32.totalorder %v1946_v41, 2147483647  ;;  %1544 = vmatpush3.bf16.msra.mxu1 %v1541_v58 }
 0x354   : > { %v822_v42 = vmax.f32 %v810_v63, 1e-16  ;;  %v1971_v5 = vcvt.s32.f32 %v853_v0  ;;  %v1976_v6 = vsel %vm1966_vm3, 2147483647, %v1909_v50  ;;  %vm1980_vm4 = vcmp.eq.s32.totalorder %v1862_v37, %v806_v4  ;;  %v1624_v50 = vpop.eup %1623 }
 0x355   : > { %1631 = vrcp.f32 %v821_v62  ;;  %v811_v7 = vand.u32 4294967168, %v803_v2  ;;  %v867_v1 = vshra.s32 %v1976_v6, 16  ;;  %v807_v9 = vand.u32 127, %v803_v2  ;;  %v1626_v17 = vpop.eup %1625 }
 0x356   : > { %1633 = vrcp.f32 %v822_v42  ;;  %856 = vmin.xlane.f32.xlu0 %v1971_v5  ;;  %v1988_v11 = vsel %vm1980_vm4, 2147483647, %v1920_v55  ;;  %v2015_v22 = vsel %vm713_vm7, %v1624_v50, 0.0  ;;  %v2028_v25 = vsel %vm714_vm13, %v1626_v17, 0.0  ;;  %v960_v50 = vld [vmem:[%s2241_s0 + $0x40] sm:$0xff] }
 0x357   : > { %v823_v12 = vmax.f32 %v811_v7, 1e-16  ;;  %v1990_v13 = vcvt.s32.f32 %v867_v1  ;;  %v881_v14 = vshra.s32 %v1988_v11, 16  ;;  %vm1994_vm5 = vcmp.eq.s32.totalorder %v1862_v37, %v807_v9  ;;  %v956_v7 = vld [vmem:[%s2241_s0 + $0x20] sm:$0xff]  ;;  %v957_v1 = vld [vmem:[%s2241_s0 + $0x28] sm:$0xff]  ;;  %v958_v9 = vld [vmem:[%s2241_s0 + $0x30] sm:$0xff] }
 0x358   : > { %v2001_v16 = vsel %vm1994_vm5, 2147483647, %v1932_v60  ;;  %v733_v39 = vsel %vm1900_vm10, %v2015_v22, 0.0  ;;  %vm818_vm9 = vcmp.lt.s32.totalorder %v1950_v52, 2147483647  ;;  %v734_v32 = vsel %vm1912_vm11, %v2028_v25, 0.0 }
 0x359   : > { %1635 = vrcp.f32 %v823_v12  ;;  %870 = vmin.xlane.f32.xlu1 %v1990_v13  ;;  %v2004_v55 = vcvt.s32.f32 %v881_v14  ;;  %v895_v18 = vshra.s32 %v2001_v16, 16  ;;  %vm819_vm10 = vcmp.lt.s32.totalorder %v803_v2, 2147483647  ;;  %v961_v12 = vld [vmem:[%s2241_s0 + $0x48] sm:$0xff]  ;;  %v962_v14 = vld [vmem:[%s2241_s0 + $0x50] sm:$0xff] }
 0x35a   : > { %v1545_v47 = vpack.c.bf16 %v955_v46, %v954_v45  ;;  %v852_v52 = vand.u32 65535, %v1960_v59  ;;  %v866_v54 = vand.u32 65535, %v1976_v6  ;;  %v880_v53 = vand.u32 65535, %v1988_v11 }
 0x35b   : > { %884 = vmin.xlane.f32.xlu0 %v2004_v55  ;;  %v2009_v19 = vcvt.s32.f32 %v895_v18  ;;  %v1628_v21 = vpop.eup %1627  ;;  %v894_v0 = vand.u32 65535, %v2001_v16  ;;  %v1549_v8 = vpack.c.bf16 %v957_v1, %v956_v7  ;;  %v1553_v11 = vpack.c.bf16 %v959_v10, %v958_v9  ;;  %v964_v16 = vld [vmem:[%s2241_s0 + $0x60] sm:$0xff] }
 0x35c   : > { %v1630_v60 = vpop.eup %1629  ;;  %v2018_v23 = vsel %vm816_vm8, %v1628_v21, 0.0  ;;  %1546 = vmatprep.subr.bf16.mxu1 %v1545_v47  ;;  %v854_v57 = vcvt.s32.f32 %v852_v52  ;;  %v868_v63 = vcvt.s32.f32 %v866_v54  ;;  %v882_v3 = vcvt.s32.f32 %v880_v53  ;;  %v967_v21 = vld [vmem:[%s2241_s0 + $0x78] sm:$0xff] }
 0x35d   : > { %898 = vmin.xlane.f32.xlu1 %v2009_v19  ;;  %v836_v38 = vsel %vm1953_vm2, %v2018_v23, 0.0  ;;  %v2049_v33 = vsel %vm715_vm15, %v1630_v60, 0.0  ;;  %1548 = vmatpush3.bf16.msra.mxu1 %v1545_v47  ;;  %v1561_v17 = vpack.c.bf16 %v963_v15, %v962_v14 }
 0x35e   : > { %v2032_v27 = vadd.f32 %v836_v38, %v732_v28  ;;  %v735_v49 = vsel %vm1925_vm12, %v2049_v33, 0.0  ;;  %1550 = vmatprep.subr.bf16.mxu1 %v1549_v8  ;;  %v1069_v28 = vld [vmem:[%s2248_s7] sm:$0xff] }
 0x35f   : > { %v1632_v24 = vpop.eup %1631  ;;  %v1070_v38 = vld [vmem:[%s2141_s26] sm:$0xff] }
 0x360   : > { %v2030_v26 = vsel %vm817_vm14, %v1632_v24, 0.0  ;;  %v1634_v29 = vpop.eup %1633  ;;  %v1074_v24 = vld [vmem:[%s2249_s8] sm:$0xff]  ;;  %1527 = vmatprep.mubr.msk.f32.mxu0 %vm472_vm0, %v1070_v38  ;;  %v1073_v38 = vld [vmem:[%s2141_s26 + $0x18] sm:$0xff] }
 0x361   : > { %v837_v40 = vsel %vm1966_vm3, %v2030_v26, 0.0  ;;  %v2042_v30 = vsel %vm818_vm9, %v1634_v29, 0.0  ;;  %1552 = vmatpush3.bf16.msra.mxu1 %v1549_v8  ;;  %1525 = vmatprep.subr.mxu0 %v1074_v24  ;;  %v1071_v29 = vld [vmem:[%s2141_s26 + $0x8] sm:$0xff]  ;;  %v844_v8 = vadd.f32 %v2018_v23, %v2011_v20  ;;  %v845_v14 = vadd.f32 %v2030_v26, %v2015_v22 }
 0x362   : > { %v2044_v31 = vadd.f32 %v837_v40, %v733_v39  ;;  %v838_v48 = vsel %vm1980_vm4, %v2042_v30, 0.0  ;;  %1554 = vmatprep.subr.bf16.mxu1 %v1553_v11  ;;  %1526 = vmatpush3.msra.mxu0 %v1074_v24  ;;  %v846_v20 = vadd.f32 %v2042_v30, %v2028_v25 }
 0x363   : > { %v1636_v34 = vpop.eup %1635  ;;  %v2054_v35 = vadd.f32 %v838_v48, %v734_v32  ;;  %1533 = vmatprep.subr.mxu0 %v1069_v28  ;;  %1528 = vmatmul.mubr.msk.f32.vlgmr.msra.gmra.mrb[4].mxu0 %vm472_vm0, %v1071_v29 }
 0x364   : > { %v2056_v36 = vsel %vm819_vm10, %v1636_v34, 0.0  ;;  %1534 = vmatpush3.msra.mxu0 %v1069_v28  ;;  %v1072_v28 = vld [vmem:[%s2141_s26 + $0x10] sm:$0xff]  ;;  %s439_s26 = scalar_lea.vmem [#allocation2], %s1414_s2  ;;  %s1718_s2 = smov [#allocation2]  }
 0x365   : > { %v839_v51 = vsel %vm1994_vm5, %v2056_v36, 0.0  ;;  %1556 = vmatpush3.bf16.msra.mxu1 %v1553_v11  ;;  %v847_v30 = vadd.f32 %v2056_v36, %v2049_v33  ;;  %1530 = vmatprep.mubr.msk.f32.mxu0 %vm472_vm0, %v1072_v28  ;;  %s1324_s28 = sshll.u32 %s439_s26, 4  ;;  %s1657_s19 = sshll.u32 %s1718_s2, 4  ;;  %s2196_s28 = int_to_ptr.vmem [resolvable:$true] %s1324_s28  ;;  %s1658_s19 = int_to_ptr.vmem [resolvable:$false] %s1657_s19 }
 0x366   : > { %v2064_v41 = vadd.f32 %v839_v51, %v735_v49  ;;  %s1653_s25 = scalar_lea.vmem %s2196_s28, 512  ;;  %s1659_s20 = scalar_lea.vmem %s1658_s19, 1024 }
 0x367   : > { %1531 = vmatmul.mubr.msk.f32.gmra.mrb[6].mxu0 %vm472_vm0, %v1073_v38  ;;  %p1654_p11 = scmp.ne.s32.totalorder %s2196_s28, %s1653_s25  ;;  %p1660_p0 = scmp.lt.s32.totalorder %s2196_s28, %s1658_s19 }
 0x368   : > { %p1661_p1 = scmp.lt.s32.totalorder %s1659_s20, %s1653_s25 }
 0x369   : > { %p1655_p12 = pnand %p1654_p11, %p1824_p5 }
 0x36a   : > { %p1662_p2 = por %p1661_p1, %p1660_p0 }
 0x36b   : > { %p1656_p13 = pneg %p1655_p12 }
 0x36d   : > { %p1663_p3 = pnand %p1662_p2, %p1656_p13 }
 0x3e3   : > { %v2080_v56 = vpop.xlane.xlu0 %856 }
 0x3e4   : > { %vm858_vm11 = vcmp.eq.f32.partialorder %v1971_v5, %v2080_v56  ;;  %v896_v5 = vcvt.s32.f32 %v894_v0  ;;  %v863_v39 = vcvt.f32.s32 %v2080_v56 }
 0x3e5   : > { %v859_v61 = vsel %vm858_vm11, %v854_v57, inf }
 0x3e6   : > { %860 = vmin.xlane.f32.xlu0 %v859_v61  ;;  %v2085_v62 = vpop.xlane.xlu1 %870  ;;  %v864_v48 = vshll.u32 %v863_v39, 16 }
 0x3e7   : > { %vm872_vm12 = vcmp.eq.f32.partialorder %v1990_v13, %v2085_v62  ;;  %v1557_v13 = vpack.c.bf16 %v961_v12, %v960_v50  ;;  %v877_v40 = vcvt.f32.s32 %v2085_v62 }
 0x3e8   : > { %v2090_v59 = vpop.xlane.xlu0 %884  ;;  %v873_v2 = vsel %vm872_vm12, %v868_v63, inf }
 0x3e9   : > { %874 = vmin.xlane.f32.xlu1 %v873_v2  ;;  %vm886_vm1 = vcmp.eq.f32.partialorder %v2004_v55, %v2090_v59  ;;  %1558 = vmatprep.subr.bf16.mxu1 %v1557_v13  ;;  %v965_v55 = vld [vmem:[%s2241_s0 + $0x68] sm:$0xff]  ;;  %v891_v49 = vcvt.f32.s32 %v2090_v59  ;;  %v878_v44 = vshll.u32 %v877_v40, 16 }
 0x3ea   : > { %v887_v4 = vsel %vm886_vm1, %v882_v3, inf  ;;  %v2094_v42 = vpop.xlane.xlu1 %898  ;;  %1560 = vmatpush3.bf16.msra.mxu1 %v1557_v13  ;;  %v1565_v18 = vpack.c.bf16 %v965_v55, %v964_v16 }
 0x3eb   : > { %888 = vmin.xlane.f32.xlu0 %v887_v4  ;;  %vm900_vm2 = vcmp.eq.f32.partialorder %v2009_v19, %v2094_v42  ;;  %v966_v19 = vld [vmem:[%s2241_s0 + $0x70] sm:$0xff]  ;;  %1562 = vmatprep.subr.bf16.mxu1 %v1561_v17  ;;  %v905_v58 = vcvt.f32.s32 %v2094_v42  ;;  %v892_v52 = vshll.u32 %v891_v49, 16 }
 0x3ec   : > { %v901_v6 = vsel %vm900_vm2, %v896_v5, inf  ;;  %v1569_v60 = vpack.c.bf16 %v967_v21, %v966_v19 }
 0x3ed   : > { %902 = vmin.xlane.f32.xlu1 %v901_v6  ;;  %v906_v0 = vshll.u32 %v905_v58, 16  ;;  %v1435_v58 = vld [vmem:[%s2250_s9] ss:$0 sm:$0xff] }
 0x3ee   : > { %1564 = vmatpush3.bf16.msra.mxu1 %v1561_v17 }
 0x3ef   : > { %1566 = vmatprep.subr.bf16.mxu1 %v1565_v18 }
 0x3f2   : > { %1568 = vmatpush3.bf16.msra.mxu1 %v1565_v18 }
 0x3f3   : > { %1570 = vmatprep.subr.bf16.mxu1 %v1569_v60 }
 0x3f6   : > { %1572 = vmatpush3.bf16.msra.mxu1 %v1569_v60 }
 0x473   : > { %v861_v32 = vpop.xlane.xlu0 %860 }
 0x474   : > { %v862_v34 = vcvt.f32.s32 %v861_v32 }
 0x476   : > { %v865_v51 = vadd.s32 %v864_v48, %v862_v34  ;;  %v875_v43 = vpop.xlane.xlu1 %874 }
 0x477   : > { %v876_v45 = vcvt.f32.s32 %v875_v43 }
 0x478   : > { %v912_v46 = vand.u32 4294967168, %v865_v51  ;;  %v889_v47 = vpop.xlane.xlu0 %888  ;;  %v908_v6 = vand.u32 127, %v865_v51  ;;  %vm920_vm3 = vcmp.lt.s32.totalorder %v865_v51, 2147483647 }
 0x479   : > { %v879_v54 = vadd.s32 %v878_v44, %v876_v45  ;;  %v890_v57 = vcvt.f32.s32 %v889_v47 }
 0x47a   : > { %v924_v53 = vmax.f32 %v912_v46, 1e-16  ;;  %v903_v56 = vpop.xlane.xlu1 %902  ;;  %vm936_vm4 = vcmp.eq.s32.totalorder %v1862_v37, %v908_v6 }
 0x47b   : > { %v913_v61 = vand.u32 4294967168, %v879_v54  ;;  %v893_v62 = vadd.s32 %v892_v52, %v890_v57  ;;  %v904_v63 = vcvt.f32.s32 %v903_v56  ;;  %v909_v1 = vand.u32 127, %v879_v54  ;;  %v1437_v56 = vld [vmem:[%s2252_s11] ss:$0 sm:$0xff] }
 0x47c   : > { %1637 = vrcp.f32 %v924_v53  ;;  %vm921_vm5 = vcmp.lt.s32.totalorder %v879_v54, 2147483647  ;;  %v1436_v54 = vld [vmem:[%s2251_s10] ss:$0 sm:$0xff] }
 0x47d   : > { %v925_v2 = vmax.f32 %v913_v61, 1e-16  ;;  %v914_v59 = vand.u32 4294967168, %v893_v62  ;;  %v907_v3 = vadd.s32 %v906_v0, %v904_v63  ;;  %v910_v10 = vand.u32 127, %v893_v62 }
 0x47e   : > { %vm937_vm6 = vcmp.eq.s32.totalorder %v1862_v37, %v909_v1  ;;  %vm922_vm7 = vcmp.lt.s32.totalorder %v893_v62, 2147483647 }
 0x47f   : > { %1639 = vrcp.f32 %v925_v2  ;;  %v926_v4 = vmax.f32 %v914_v59, 1e-16  ;;  %v915_v5 = vand.u32 4294967168, %v907_v3  ;;  %v911_v16 = vand.u32 127, %v907_v3 }
 0x480   : > { %vm938_vm8 = vcmp.eq.s32.totalorder %v1862_v37, %v910_v10  ;;  %vm923_vm13 = vcmp.lt.s32.totalorder %v907_v3, 2147483647 }
 0x481   : > { %1641 = vrcp.f32 %v926_v4  ;;  %v927_v42 = vmax.f32 %v915_v5, 1e-16  ;;  %vm939_vm14 = vcmp.eq.s32.totalorder %v1862_v37, %v911_v16 }
 0x483   : > { %1643 = vrcp.f32 %v927_v42 }
 0x486   : > { %v1638_v7 = vpop.eup %1637 }
 0x487   : > { %v932_v9 = vsel %vm920_vm3, %v1638_v7, 0.0 }
 0x488   : > { %v940_v11 = vsel %vm936_vm4, %v932_v9, 0.0  ;;  %v948_v50 = vadd.f32 %v932_v9, %v844_v8 }
 0x489   : > { %v1640_v12 = vpop.eup %1639  ;;  %v944_v13 = vadd.f32 %v940_v11, %v2032_v27 }
 0x48a   : > { %v933_v15 = vsel %vm921_vm5, %v1640_v12, 0.0  ;;  %vm1053_vm15 = vcmp.gt.f32.partialorder %v948_v50, 0.0 }
 0x48b   : > { %v1642_v23 = vpop.eup %1641  ;;  %1519 = vmatprep.mubr.f32.mxu1 %v944_v13  ;;  %v941_v17 = vsel %vm937_vm6, %v933_v15, 0.0  ;;  %v949_v55 = vadd.f32 %v933_v15, %v845_v14 }
 0x48c   : > { %v945_v18 = vadd.f32 %v941_v17, %v2044_v31  ;;  %v934_v19 = vsel %vm922_vm7, %v1642_v23, 0.0 }
 0x48d   : > { %v942_v27 = vsel %vm938_vm8, %v934_v19, 0.0  ;;  %v950_v22 = vadd.f32 %v934_v19, %v846_v20  ;;  %v1644_v26 = vpop.eup %1643  ;;  %1645 = vrcp.f32 %v949_v55  ;;  %vm1054_vm9 = vcmp.gt.f32.partialorder %v949_v55, 0.0 }
 0x48e   : > { %1520 = vmatmul.mubr.f32.vlgmr.msra.gmra.mrb[0].mxu1 %v945_v18  ;;  %v946_v25 = vadd.f32 %v942_v27, %v2054_v35  ;;  %v935_v21 = vsel %vm923_vm13, %v1644_v26, 0.0  ;;  %1647 = vrcp.f32 %v948_v50 }
 0x48f   : > { %v943_v31 = vsel %vm939_vm14, %v935_v21, 0.0  ;;  %v951_v60 = vadd.f32 %v935_v21, %v847_v30  ;;  %vm1055_vm11 = vcmp.gt.f32.partialorder %v950_v22, 0.0 }
 0x490   : > { %1522 = vmatprep.mubr.f32.mxu1 %v946_v25  ;;  %v947_v24 = vadd.f32 %v943_v31, %v2064_v41 }
 0x491   : > { %1649 = vrcp.f32 %v951_v60  ;;  %vm1056_vm10 = vcmp.gt.f32.partialorder %v951_v60, 0.0 }
 0x492   : > { %1523 = vmatmul.mubr.f32.gmra.mrb[2].mxu1 %v947_v24  ;;  %1651 = vrcp.f32 %v950_v22 }
 0x497   : > { %v1646_v33 = vpop.eup %1645 }
 0x498   : > { %v1648_v35 = vpop.eup %1647  ;;  %v1062_v36 = vsel %vm1054_vm9, %v1646_v33, 0.0 }
 0x499   : > { %v1061_v41 = vsel %vm1053_vm15, %v1648_v35, 0.0 }
 0x49b   : > { %v1650_v40 = vpop.eup %1649 }
 0x49c   : > { %v1652_v48 = vpop.eup %1651  ;;  %v1064_v49 = vsel %vm1056_vm10, %v1650_v40, 0.0 }
 0x49d   : > { %v1063_v44 = vsel %vm1055_vm11, %v1652_v48, 0.0 }
 0x561   : > { %v1521_v37 = vpop.f32.mrb[0].mxu1 }
 0x562   : > { %v1066_v29 = vmul.f32 %v1521_v37, %v1062_v36  ;;  %v1034_v39 = vpop.f32.mrb[1].mxu1 }
 0x563   : > { %v1065_v32 = vmul.f32 %v1061_v41, %v1034_v39 }
 0x565   : > { %1535 = vmatprep.mubr.msk.f32.mxu0 %vm472_vm0, %v1065_v32  ;;  %v1524_v34 = vpop.f32.mrb[2].mxu1 }
 0x566   : > { %1536 = vmatmul.mubr.msk.f32.vlgmr.msra.gmra.mrb[4].mxu0 %vm472_vm0, %v1066_v29  ;;  %v1068_v51 = vmul.f32 %v1524_v34, %v1064_v49  ;;  %v1044_v43 = vpop.f32.mrb[3].mxu1 }
 0x567   : > { %v1067_v45 = vmul.f32 %v1063_v44, %v1044_v43 }
 0x569   : > { %1538 = vmatprep.mubr.msk.f32.mxu0 %vm472_vm0, %v1067_v45 }
 0x56a   : > { %1539 = vmatmul.mubr.msk.f32.gmra.mrb[6].mxu0 %vm472_vm0, %v1068_v51 }
 0x639   : > { %v1537_v46 = vpop.f32.mrb[4].mxu0 }
 0x63a   : > { %v1277_v47 = vadd.f32 %v1537_v46, %v1435_v58  ;;  %v1250_v52 = vpop.f32.mrb[5].mxu0 }
 0x63b   : > { %v1276_v57 = vadd.f32 %v1435_v58, %v1250_v52 }
 0x63c   : > { %v1281_v53 = vmax.f32 %v1277_v47, 0.0 }
 0x63d   : > { %v1280_v61 = vmax.f32 %v1276_v57, 0.0  ;;  %v1540_v63 = vpop.f32.mrb[6].mxu0 }
 0x63e   : > { %v1292_v62 = vmul.f32 %v1436_v54, %v1281_v53  ;;  %v1279_v2 = vadd.f32 %v1540_v63, %v1435_v58  ;;  %v1260_v59 = vpop.f32.mrb[7].mxu0 }
 0x63f   : > { %v1291_v0 = vmul.f32 %v1436_v54, %v1280_v61  ;;  %v1278_v4 = vadd.f32 %v1435_v58, %v1260_v59 }
 0x640   : > { %v1303_v3 = vadd.f32 %v1437_v56, %v1292_v62  ;;  %v1283_v42 = vmax.f32 %v1279_v2, 0.0 }
 0x641   : > { %v1302_v5 = vadd.f32 %v1437_v56, %v1291_v0  ;;  %v1282_v6 = vmax.f32 %v1278_v4, 0.0 }
 0x642   : > { %1307 = vst [vmem:[%s439_s26 + $0x8] sm:$0xff] %v1303_v3  ;;  %v1294_v7 = vmul.f32 %v1436_v54, %v1283_v42 }
 0x643   : > { %1306 = vst [vmem:[%s439_s26] sm:$0xff] %v1302_v5  ;;  %v1293_v1 = vmul.f32 %v1436_v54, %v1282_v6 }
 0x644   : > { %v1305_v8 = vadd.f32 %v1437_v56, %v1294_v7 }
 0x645   : > { %v1304_v9 = vadd.f32 %v1437_v56, %v1293_v1 }
 0x646   : > { %1309 = vst [vmem:[%s439_s26 + $0x18] sm:$0xff] %v1305_v8 }
 0x647   : > { %1308 = vst [vmem:[%s439_s26 + $0x10] sm:$0xff] %v1304_v9 }
 0x648   : > { %1666 = shalt.err (!%p1663_p3)
}
 0x649   : > { %s1667_s16 = scalar_lea.hbm %s2194_s17, 512  ;;  %s1671_s18 = scalar_lea.hbm %s2253_s12, 1024 }
 0x64a   : > { %p1668_p4 = scmp.ne.s32.totalorder %s2194_s17, %s1667_s16  ;;  %p1672_p9 = scmp.lt.u32.totalorder %s2194_s17, %s2253_s12 }
 0x64b   : > { %p1673_p10 = scmp.lt.u32.totalorder %s1671_s18, %s1667_s16  ;;  %p1675_p12 = scmp.lt.u32.totalorder %s1667_s16, %s2194_s17 }
 0x64c   : > { %p1669_p7 = pnand %p1668_p4, %p1824_p5 }
 0x64d   : > { %p1674_p11 = por %p1673_p10, %p1672_p9 }
 0x64e   : > { %p1670_p8 = pneg %p1669_p7 }
 0x64f   : > { %p1676_p13 = por %p1675_p12, %p1674_p11 }
 0x651   : > { %p1677_p0 = pnand %p1676_p13, %p1670_p8 }
 0x653   : > { %1680 = shalt.err (!%p1677_p0)
}
 0x654   : > { %s1719_s25 = smov 128   ;;  %s1720_s19 = smov 8  }
 0x655   : > { %1577 = dma.vmem_to_hbm [thread:$0]  (%p1824_p5), %s2196_s28, 512, %s2194_s17, %s2200_s1, %s1719_s25, %s1719_s25, %s1720_s19  }
 0x656 PF: > { %p1583_p1 = scmp.ge.s32.totalorder %s1715_s24, 2  ;;  %s1339_s20 = sand.u32 1, %s1703_s21  }
 0x657   : > { %s1340_s16 = scalar_lea.sflag [#allocation3], %s1339_s20 }
 0x658   : > { %p1580_p2 = pnand %p1583_p1, %p1828_p6 }
 0x65a   : > { %1698 = dma.done.wait (!%p1580_p2), %s1340_s16, 512  }
 0x65b   : > { %1700 = vsyncadd (!%p1580_p2), %s1340_s16, 4294966784  ;;  %p22_p3 = scmp.ge.s32.totalorder %s1811_s27, 4   ;;  %s2276_s21 = smov %s1707_s22 }
 0x65c   : > { %s2277_s22 = smov %s1711_s23  ;;  %s2278_s23 = smov %s1822_s30 }
 0x65d   : > { %s2279_s24 = smov %s1811_s27  ;;  %24 = sbr.rel (!%p22_p3) target bundleno = 6 (0x6), region = 109 }
 0x664   :  { %1345 = vsyncpa [#allocation3], 1 }
 0x665   :  { %1347 = vsyncpa [#allocation3 + $0x1], 1 }

</bundles_post_ra>
